<compile_context>
chip_gen: v7x
topology: tpu7x:2x2x1
jax: 0.10.0
libtpu: 0.0.40
codegen_flags: <defaults>
</compile_context>

<pallas_src>
import functools

import jax
import jax.numpy as jnp
from jax.experimental import pallas as pl
from jax.experimental.pallas import tpu as pltpu


# --------------------------------------------------------------------------- #
# Pass 1: linear projection + attention-score reduction (computed once).
# --------------------------------------------------------------------------- #
def gat_project_kernel(x_ref, w_ref, att_ref, h_ref, alpha_ref):
    """h = x @ W ; alpha = h @ att_mat (block-diagonal -> per-head src/dst scores)."""
    h = jnp.dot(x_ref[...], w_ref[...], preferred_element_type=jnp.float32)
    h_ref[...] = h
    alpha_ref[...] = jnp.dot(h, att_ref[...], preferred_element_type=jnp.float32)


# --------------------------------------------------------------------------- #
# Pass 2: masked softmax attention + neighbor aggregation (online softmax).
# --------------------------------------------------------------------------- #
def gat_attend_kernel(h_ref, a_srcT_ref, a_dst_ref, adj_ref, bias_ref, expand_ref,
                      out_ref, m_sc, l_sc, acc_sc, *, heads, out_channels):
    """Grid = (dst tiles [parallel], src tiles [arbitrary/reduction])."""
    H, Fp = heads, out_channels
    j = pl.program_id(1)

    @pl.when(j == 0)
    def _init():
        m_sc[...] = jnp.full_like(m_sc, -1e30)     # finite; avoids inf-inf NaNs
        l_sc[...] = jnp.zeros_like(l_sc)
        acc_sc[...] = jnp.zeros_like(acc_sc)

    # Additive neighborhood mask, hoisted out of the per-head loop.
    mask_add = jnp.where(adj_ref[...] > 0, jnp.float32(0.0), jnp.float32(-1e9))

    h_src = h_ref[...]          # (Ts, H*Fp) f32  projected source features
    a_srcT = a_srcT_ref[...]    # (H, Ts)    f32  per-source scores (pre-transposed)
    a_dst = a_dst_ref[...]      # (Td, H)    f32  per-target scores

    # Per-head online softmax; only one head's (Td, Ts) logits live at a time and
    # partial results go straight into the persistent scratch accumulators.
    for hh in range(H):
        e = a_dst[:, hh:hh + 1] + a_srcT[hh:hh + 1, :]               # (Td, Ts)
        e = jnp.where(e > 0, e, 0.2 * e)                             # LeakyReLU(0.2)
        e = e + mask_add
        m_prev = m_sc[:, hh:hh + 1]                                  # (Td, 1)
        m_new = jnp.maximum(m_prev, jnp.max(e, axis=-1, keepdims=True))
        p = jnp.exp(e - m_new)                                       # masked -> 0
        scale = jnp.exp(m_prev - m_new)                              # (Td, 1)
        l_sc[:, hh:hh + 1] = scale * l_sc[:, hh:hh + 1] + jnp.sum(
            p, axis=-1, keepdims=True)
        cols = slice(hh * Fp, (hh + 1) * Fp)
        acc_sc[:, cols] = scale * acc_sc[:, cols] + jnp.dot(
            p, h_src[:, cols], preferred_element_type=jnp.float32)
        m_sc[:, hh:hh + 1] = m_new

    @pl.when(j == pl.num_programs(1) - 1)
    def _finalize():
        # Expand per-head 1/l to the H*Fp lane layout with one tiny matmul, then
        # one contiguous lane-dense store.  Exact division (not approx reciprocal)
        # keeps attention rows summing to 1 and is interpret-mode safe.
        inv_l = 1.0 / l_sc[...]                                      # (Td, H)
        inv_full = jnp.dot(inv_l, expand_ref[...],
                           preferred_element_type=jnp.float32)       # (Td, H*Fp)
        out_ref[...] = (acc_sc[...] * inv_full + bias_ref[...]).astype(out_ref.dtype)


# --------------------------------------------------------------------------- #
# Glue
# --------------------------------------------------------------------------- #
def _dense_adjacency(edge_index, num_nodes):
    """adj[dst, src] = 1 for every edge src->dst, plus self loops (int8)."""
    adj = jnp.zeros((num_nodes, num_nodes), jnp.int8)
    adj = adj.at[edge_index[1], edge_index[0]].set(1)
    adj = adj.at[jnp.arange(num_nodes), jnp.arange(num_nodes)].set(1)
    return adj


def _pick_tile(n, cap, align):
    """Largest t <= cap with n % t == 0 and (t % align == 0 or t == n)."""
    cap = max(1, min(cap, n))
    for t in range(cap, 0, -1):
        if n % t == 0 and (t % align == 0 or t == n):
            return t
    return n


def _vmem_limit_bytes():
    """Generation-aware VMEM budget: ~75% of physical, capped at 96 MiB."""
    try:
        cap = int(pltpu.get_tpu_info().vmem_capacity_bytes)
    except Exception:                      # non-TPU backend / interpret mode
        cap = 128 * 1024 * 1024
    return min(cap * 3 // 4, 96 * 1024 * 1024)


def simple_gat_forward(x, edge_index, W, att_src, att_dst, bias, heads,
                       out_channels, tile_dst=None, tile_src=None):
    N, F = x.shape
    H, Fp = heads, out_channels
    HFp = H * Fp

    # dst tile: >= 2 grid steps when possible (v7x megacore); sublane aligned.
    if tile_dst is None:
        tile_dst = _pick_tile(N, cap=min(256, max(8, N // 2)), align=8)
    # src tile: lane aligned (128) unless it must be the full array.
    if tile_src is None:
        tile_src = _pick_tile(N, cap=min(512, N), align=128)
    assert N % tile_dst == 0 and N % tile_src == 0

    # TODO(synk): edge_index -> dense adjacency scatter stays in XLA; a CSR /
    # scalar-prefetch gather path (and 1-bit packed masks) would be needed for
    # very large, very sparse graphs to cut the O(N^2) adjacency DMA.
    adj = _dense_adjacency(edge_index, N)                            # (N, N) int8

    # Block-diagonal attention matrix:
    #   att_mat[h*Fp + f, h]     = att_src[h, f]
    #   att_mat[h*Fp + f, H + h] = att_dst[h, f]
    eye = jnp.eye(H, dtype=jnp.float32)
    a_src_m = (att_src.reshape(H, Fp)[:, :, None] * eye[:, None, :]).reshape(HFp, H)
    a_dst_m = (att_dst.reshape(H, Fp)[:, :, None] * eye[:, None, :]).reshape(HFp, H)
    att_mat = jnp.concatenate([a_src_m, a_dst_m], axis=-1).astype(jnp.float32)

    x_f = x.astype(jnp.float32)
    W_f = W.astype(jnp.float32)
    vmem_limit = _vmem_limit_bytes()
    num_dst = N // tile_dst
    num_src = N // tile_src

    # ---- Pass 1: projection + scores, computed once (not per dst tile). ---- #
    h_all, alpha = pl.pallas_call(
        gat_project_kernel,
        out_shape=(jax.ShapeDtypeStruct((N, HFp), jnp.float32),
                   jax.ShapeDtypeStruct((N, 2 * H), jnp.float32)),
        grid=(num_dst,),
        in_specs=[
            pl.BlockSpec((tile_dst, F), lambda i: (i, 0)),           # x rows
            pl.BlockSpec((F, HFp), lambda i: (0, 0)),                # W (all heads)
            pl.BlockSpec((HFp, 2 * H), lambda i: (0, 0)),            # block-diag att
        ],
        out_specs=(pl.BlockSpec((tile_dst, HFp), lambda i: (i, 0)),
                   pl.BlockSpec((tile_dst, 2 * H), lambda i: (i, 0))),
        compiler_params=pltpu.CompilerParams(
            dimension_semantics=("parallel",),
            vmem_limit_bytes=vmem_limit),
    )(x_f, W_f, att_mat)

    # Tiny layout plumbing outside the hot loop (done once, not per tile).
    a_srcT = alpha[:, :H].T                                          # (H, N)
    a_dst = alpha[:, H:]                                             # (N, H)
    bias2d = bias.reshape(1, HFp).astype(jnp.float32)
    # Head-expansion matrix: expand[h, h*Fp + f] = 1  (broadcast 1/l per head).
    expand = jnp.repeat(jnp.eye(H, dtype=jnp.float32), Fp, axis=1)   # (H, H*Fp)

    kernel = functools.partial(gat_attend_kernel, heads=H, out_channels=Fp)

    # ---- Pass 2: masked online-softmax attention + aggregation. ---- #
    out = pl.pallas_call(
        kernel,
        out_shape=jax.ShapeDtypeStruct((N, HFp), jnp.float32),
        grid=(num_dst, num_src),
        in_specs=[
            pl.BlockSpec((tile_src, HFp), lambda i, j: (j, 0)),      # h (source rows)
            pl.BlockSpec((H, tile_src), lambda i, j: (0, j)),        # per-source scores
            pl.BlockSpec((tile_dst, H), lambda i, j: (i, 0)),        # per-target scores
            pl.BlockSpec((tile_dst, tile_src), lambda i, j: (i, j)), # adjacency (int8)
            pl.BlockSpec((1, HFp), lambda i, j: (0, 0)),             # bias
            pl.BlockSpec((H, HFp), lambda i, j: (0, 0)),             # head-expand matrix
        ],
        out_specs=pl.BlockSpec((tile_dst, HFp), lambda i, j: (i, 0)),
        scratch_shapes=[
            pltpu.VMEM((tile_dst, H), jnp.float32),                  # running max
            pltpu.VMEM((tile_dst, H), jnp.float32),                  # running sum
            pltpu.VMEM((tile_dst, HFp), jnp.float32),                # output accumulator
        ],
        compiler_params=pltpu.CompilerParams(
            dimension_semantics=("parallel", "arbitrary"),
            vmem_limit_bytes=vmem_limit),
    )(h_all, a_srcT, a_dst, adj, bias2d, expand)
    return out


def gat_reference(x, edge_index, W, att_src, att_dst, bias, heads, out_channels):
    """Pure-JAX f32 reference (PyG GATConv, concat heads, dropout=0, self loops)."""
    N, _ = x.shape
    H, Fp = heads, out_channels
    adj = _dense_adjacency(edge_index, N) > 0                        # (N, N) bool
    h = (x @ W).reshape(N, H, Fp)
    a_src = jnp.einsum('nhf,hf->nh', h, att_src.reshape(H, Fp))
    a_dst = jnp.einsum('nhf,hf->nh', h, att_dst.reshape(H, Fp))
    e = a_dst[:, None, :] + a_src[None, :, :]                        # (dst, src, H)
    e = jnp.where(e > 0, e, 0.2 * e)
    e = jnp.where(adj[:, :, None], e, -1e9)
    p = jnp.exp(e - e.max(axis=1, keepdims=True)) * adj[:, :, None]
    attn = p / p.sum(axis=1, keepdims=True)
    out = jnp.einsum('ijh,jhf->ihf', attn, h).reshape(N, H * Fp)
    return out + bias


if __name__ == "__main__":
    # Small shapes consistent with SimpleGATModel(in_channels, out_channels, heads).
    N = 16            # number of graph nodes
    in_channels = 8
    out_channels = 8
    heads = 2

    key = jax.random.PRNGKey(0)
    kx, kw, ks, kd, ke = jax.random.split(key, 5)

    # Node features [N, in_channels].
    x = jax.random.normal(kx, (N, in_channels), dtype=jnp.float32)

    # Deterministic GAT-layer parameters.
    W = jax.random.normal(kw, (in_channels, heads * out_channels),
                          dtype=jnp.float32) * 0.1
    att_src = jax.random.normal(ks, (heads * out_channels,), dtype=jnp.float32) * 0.1
    att_dst = jax.random.normal(kd, (heads * out_channels,), dtype=jnp.float32) * 0.1
    bias = jnp.zeros((heads * out_channels,), dtype=jnp.float32)

    # Deterministic sparse connectivity: edge_index [2, E] (src row, dst row).
    E = 48
    src = jax.random.randint(ke, (E,), 0, N, dtype=jnp.int32)
    dst = (src + 1 + jnp.arange(E, dtype=jnp.int32) % (N - 1)) % N
    edge_index = jnp.stack([src, dst], axis=0)

    out = simple_gat_forward(x, edge_index, W, att_src, att_dst, bias,
                             heads, out_channels)
    jax.block_until_ready(out)
    assert out.shape == (N, heads * out_channels)

    # Tolerance check vs. pure-f32 reference.
    ref = gat_reference(x, edge_index, W, att_src, att_dst, bias,
                        heads, out_channels)
    max_err = float(jnp.max(jnp.abs(out - ref)))
    assert jnp.allclose(out, ref, atol=1e-2, rtol=1e-2), max_err

    print("KERNEL_OK")
</pallas_src>

<mosaic_0001>
module attributes {stable_mosaic.version = 11 : i64} {
  func.func @gat_project_kernel(%arg0: i32, %arg1: memref<8x8xf32, #tpu.memory_space<vmem>>, %arg2: memref<8x16xf32, #tpu.memory_space<vmem>>, %arg3: memref<16x4xf32, #tpu.memory_space<vmem>>, %arg4: memref<8x16xf32, #tpu.memory_space<vmem>>, %arg5: memref<8x4xf32, #tpu.memory_space<vmem>>) attributes {dimension_semantics = [#tpu.dimension_semantics<parallel>], iteration_bounds = array<i64: 2>, scalar_prefetch = 0 : i64, scratch_operands = 0 : i64, tpu.core_type = #tpu.core_type<tc>, window_params = [{transform_indices = @transform_0, window_bounds = array<i64: 8, 8>}, {pipeline_mode = #tpu.pipeline_mode<synchronous>, transform_indices = @transform_1, window_bounds = array<i64: 8, 16>}, {pipeline_mode = #tpu.pipeline_mode<synchronous>, transform_indices = @transform_2, window_bounds = array<i64: 16, 4>}, {transform_indices = @transform_3, window_bounds = array<i64: 8, 16>}, {transform_indices = @transform_4, window_bounds = array<i64: 8, 4>}]} {
    %c0 = arith.constant 0 : index
    %c0_0 = arith.constant 0 : index
    %0 = vector.load %arg1[%c0, %c0_0] : memref<8x8xf32, #tpu.memory_space<vmem>>, vector<8x8xf32>
    %c0_1 = arith.constant 0 : index
    %c0_2 = arith.constant 0 : index
    %1 = vector.load %arg2[%c0_1, %c0_2] : memref<8x16xf32, #tpu.memory_space<vmem>>, vector<8x16xf32>
    %cst = arith.constant dense<0.000000e+00> : vector<8x16xf32>
    %2 = tpu.matmul %0, %1, %cst {dimension_numbers = #tpu.dot_dimension_numbers<[1], [0], [0], [1], [0, 0, 1, 1], [], []>} : vector<8x8xf32>, vector<8x16xf32>, vector<8x16xf32> -> vector<8x16xf32>
    %c0_3 = arith.constant 0 : index
    %c0_4 = arith.constant 0 : index
    %3 = vector.load %arg4[%c0_3, %c0_4] : memref<8x16xf32, #tpu.memory_space<vmem>>, vector<8x16xf32>
    tpu.vector_store %arg4[%c0_3, %c0_4], %2 {strides = array<i32>} : memref<8x16xf32, #tpu.memory_space<vmem>>, vector<8x16xf32>,
    %c0_5 = arith.constant 0 : index
    %c0_6 = arith.constant 0 : index
    %4 = vector.load %arg3[%c0_5, %c0_6] : memref<16x4xf32, #tpu.memory_space<vmem>>, vector<16x4xf32>
    %cst_7 = arith.constant dense<0.000000e+00> : vector<8x4xf32>
    %5 = tpu.matmul %2, %4, %cst_7 {dimension_numbers = #tpu.dot_dimension_numbers<[1], [0], [0], [1], [0, 0, 1, 1], [], []>} : vector<8x16xf32>, vector<16x4xf32>, vector<8x4xf32> -> vector<8x4xf32>
    %c0_8 = arith.constant 0 : index
    %c0_9 = arith.constant 0 : index
    %6 = vector.load %arg5[%c0_8, %c0_9] : memref<8x4xf32, #tpu.memory_space<vmem>>, vector<8x4xf32>
    tpu.vector_store %arg5[%c0_8, %c0_9], %5 {strides = array<i32>} : memref<8x4xf32, #tpu.memory_space<vmem>>, vector<8x4xf32>,
    return
  }
  func.func @transform_0(%arg0: i32) -> (i32, i32) {
    %c0_i32 = arith.constant 0 : i32
    %c0_i32_0 = arith.constant 0 : i32
    return %arg0, %c0_i32 : i32, i32
  }
  func.func @transform_1(%arg0: i32) -> (i32, i32) {
    %c0_i32 = arith.constant 0 : i32
    %c0_i32_0 = arith.constant 0 : i32
    %c0_i32_1 = arith.constant 0 : i32
    return %c0_i32, %c0_i32_0 : i32, i32
  }
  func.func @transform_2(%arg0: i32) -> (i32, i32) {
    %c0_i32 = arith.constant 0 : i32
    %c0_i32_0 = arith.constant 0 : i32
    %c0_i32_1 = arith.constant 0 : i32
    return %c0_i32, %c0_i32_0 : i32, i32
  }
  func.func @transform_3(%arg0: i32) -> (i32, i32) {
    %c0_i32 = arith.constant 0 : i32
    %c0_i32_0 = arith.constant 0 : i32
    return %arg0, %c0_i32 : i32, i32
  }
  func.func @transform_4(%arg0: i32) -> (i32, i32) {
    %c0_i32 = arith.constant 0 : i32
    %c0_i32_0 = arith.constant 0 : i32
    return %arg0, %c0_i32 : i32, i32
  }
}

</mosaic_0001>

<bundles_post_ra>
// kernel: tpu_custom_call.1
= control target key start
LH: loop header
LB: loop body
LE: loop exit
PB: predicated region body
PF: predicated region fallthrough
CT: control target
= control target key end

     0   :  { %10 = vsyncpa [#allocation3], 0  ;;  %s1156_s0 = inlined_call_operand.hbm [shape: f32[16,8], index: 0, kind: input, shape index: {}]   ;;  %s1157_s1 = inlined_call_operand.hbm [shape: f32[8,16], index: 1, kind: input, shape index: {}]   ;;  %s1158_s2 = inlined_call_operand.hbm [shape: f32[16,4], index: 2, kind: input, shape index: {}]   ;;  %s1159_s3 = inlined_call_operand.hbm [shape: f32[16,16], index: 3, kind: output, shape index: {0}]   ;;  %s1160_s4 = inlined_call_operand.hbm [shape: f32[16,4], index: 4, kind: output, shape index: {1}]  }
   0x1   :  { %12 = vsyncpa [#allocation3 + $0x1], 0 }
   0x2   :  { %13 = vsyncpa [#allocation6], 0 }
   0x3   :  { %14 = vsyncpa [#allocation4], 0 }
   0x4   :  { %16 = vsyncpa [#allocation4 + $0x1], 0 }
   0x5   :  { %17 = vsyncpa [#allocation10], 0 }
   0x6   :  { %19 = vsyncpa [#allocation10 + $0x1], 0  ;;  %s902_s15 = smov 0   ;;  %s904_s16 = smov 0  }
   0x7   :  { %s906_s17 = smov 0   ;;  %s908_s18 = smov 0  }
   0x8 LB: > { %s923_s19 = sadd.s32 4294967295, %s865_s18   ;;  %s559_s20 = sadd.s32 4294967294, %s865_s18   ;;  %s865_s18 = sphi %s908_s18, %s1180_s18   ;;  %s861_s17 = sphi %s906_s17, %s1179_s17   ;;  %s857_s16 = sphi %s904_s16, %s1178_s16   ;;  %s853_s15 = sphi %s902_s15, %s1177_s15  }
   0x9   : > { %p45_p0 = scmp.ne.s32.totalorder %s857_s16, %s853_s15  ;;  %p1161_p1 = scmp.eq.s32.totalorder %s923_s19, 0 }
   0xa   : > { %p117_p3 = scmp.eq.s32.totalorder %s559_s20, 1  ;;  %p560_p5 = scmp.ge.s32.totalorder %s865_s18, 1 }
   0xb   : > { %p932_p4 = por %p1161_p1, %p45_p0  ;;  %p150_p7 = scmp.lt.s32.totalorder %s865_s18, 3 }
   0xc   : > { %p937_p6 = por %p117_p3, %p45_p0  ;;  %s867_s24 = smov [#allocation5]  }
   0xd   : > { %s1164_s21 = scalar_select %p932_p4, 1, 0 }
   0xe   : > { %s1165_s22 = scalar_select %p937_p6, 1, 0 }
   0xf   : > { %p942_p8 = pnand %p560_p5, %p150_p7  ;;  %s163_s25 = sshll.u32 %s867_s24, 4  ;;  %s164_s25 = int_to_ptr.vmem [resolvable:$true] %s163_s25 }
  0x10   : > { %s868_s26 = smov [#allocation7]   ;;  %s677_s5 = scalar_lea.hbm %s1157_s1, 128 }
  0x11   : > { %s1166_s23 = scalar_select %p942_p8, 1, 0 }
  0x12   : > { %p614_p10 = pneg %p942_p8  ;;  %s173_s27 = sshll.u32 %s868_s26, 4  ;;  %s955_s27 = int_to_ptr.vmem [resolvable:$true] %s173_s27 }
  0x13   : > { %p678_p12 = scmp.ne.s32.totalorder %s1157_s1, %s677_s5  ;;  %p684_p5 = scmp.lt.u32.totalorder %s677_s5, %s1157_s1 }
  0x14   : > { %p951_p11 = pnand %p614_p10, %p1161_p1 }
  0x16   : > { %p679_p13 = pneg %p951_p11 }
  0x18   : > { %p680_p0 = pnand %p679_p13, %p678_p12 }
  0x1a   : > { %p681_p3 = pneg %p680_p0 }
  0x1c   : > { %p686_p7 = pnand %p684_p5, %p681_p3 }
  0x1e   : > { %689 = shalt.err (!%p686_p7)
}
  0x1f   : > { %s690_s10 = scalar_lea.vmem %s164_s25, 128  ;;  %p698_p2 = scmp.lt.s32.totalorder %s164_s25, %s164_s25 }
  0x20   : > { %p691_p10 = scmp.ne.s32.totalorder %s164_s25, %s690_s10  ;;  %p699_p6 = scmp.lt.s32.totalorder %s690_s10, %s690_s10 }
  0x22   : > { %p693_p9 = pnand %p691_p10, %p679_p13  ;;  %p700_p4 = por %p699_p6, %p698_p2 }
  0x24   : > { %p694_p1 = pneg %p693_p9 }
  0x26   : > { %p701_p8 = pnand %p700_p4, %p694_p1 }
  0x28   : > { %704 = shalt.err (!%p701_p8)
}
  0x29   : > { %617 = dma.hbm_to_vmem [thread:$0]  (!%p951_p11), %s1157_s1, 128, %s164_s25, [#allocation6]  }
  0x2a   : > { %s705_s20 = scalar_lea.hbm %s1158_s2, 256 }
  0x2b   : > { %p706_p9 = scmp.ne.s32.totalorder %s1158_s2, %s705_s20  ;;  %p712_p4 = scmp.lt.u32.totalorder %s705_s20, %s1158_s2 }
  0x2d   : > { %p708_p2 = pnand %p706_p9, %p679_p13 }
  0x2f   : > { %p709_p1 = pneg %p708_p2 }
  0x31   : > { %p714_p6 = pnand %p712_p4, %p709_p1 }
  0x33   : > { %717 = shalt.err (!%p714_p6)
}
  0x34   : > { %s718_s25 = scalar_lea.vmem %s955_s27, 256  ;;  %p726_p3 = scmp.lt.s32.totalorder %s955_s27, %s955_s27 }
  0x35   : > { %p719_p8 = scmp.ne.s32.totalorder %s955_s27, %s718_s25  ;;  %p727_p5 = scmp.lt.s32.totalorder %s718_s25, %s718_s25 }
  0x37   : > { %p721_p12 = pnand %p719_p8, %p679_p13  ;;  %p728_p7 = por %p727_p5, %p726_p3 }
  0x39   : > { %p722_p0 = pneg %p721_p12 }
  0x3b   : > { %p729_p10 = pnand %p728_p7, %p722_p0 }
  0x3d   : > { %732 = shalt.err (!%p729_p10)
}
  0x3e   : > { %s869_s5 = smov 128   ;;  %s870_s6 = smov 8  }
  0x3f   : > { %620 = dma.hbm_to_vmem [thread:$0]  (!%p951_p11), %s1158_s2, 256, %s955_s27, [#allocation6], %s869_s5, %s869_s5, %s870_s6  }
  0x40   : > { %s1005_s9 = sadd.s32 1, %s865_s18   ;;  %s32_s10 = sadd.s32 1, %s861_s17 }
  0x41   : > { %s29_s11 = ssub.s32 %s865_s18, %s1005_s9  ;;  %p39_p13 = scmp.ne.s32.totalorder %s861_s17, %s857_s16 }
  0x42   : > { %p30_p9 = scmp.eq.s32.totalorder %s29_s11, 0  ;;  %p40_p2 = scmp.eq.s32.totalorder %s865_s18, 0 }
  0x43   : > { %p1168_p1 = scmp.eq.s32.totalorder %s923_s19, 1  ;;  %p634_p6 = scmp.lt.s32.totalorder %s865_s18, 2 }
  0x44   : > { %s1021_s13 = scalar_select %p30_p9, %s861_s17, %s32_s10  }
  0x45   : > { %p1015_p4 = por %p1168_p1, %p39_p13  ;;  %p41_p8 = por %p40_p2, %p39_p13 }
  0x46   : > { %s187_s28 = sand.u32 1, %s861_s17   ;;  %s565_s27 = sshll.u32 %s865_s18, 7 }
  0x47   : > { %s564_s14 = sshll.u32 %s187_s28, 3  ;;  %s1028_s26 = scalar_lea.hbm %s1156_s0, %s565_s27 }
  0x48   : > { %s191_s29 = scalar_lea.vmem [#allocation2], %s564_s14  ;;  %p1032_p11 = pnand %p634_p6, %p41_p8 }
  0x49   : > { %s198_s30 = sshll.u32 %s191_s29, 4  ;;  %s188_s5 = scalar_lea.sflag [#allocation3], %s187_s28  ;;  %s1030_s30 = int_to_ptr.vmem [resolvable:$true] %s198_s30 }
  0x4a   : > { %s733_s6 = scalar_lea.hbm %s1028_s26, 128  ;;  %p735_p0 = pneg %p1032_p11 }
  0x4b   : > { %p734_p12 = scmp.ne.s32.totalorder %s1028_s26, %s733_s6  ;;  %s738_s10 = scalar_lea.hbm %s1156_s0, 256 }
  0x4c   : > { %p739_p7 = scmp.lt.u32.totalorder %s1028_s26, %s1156_s0  ;;  %p740_p10 = scmp.lt.u32.totalorder %s738_s10, %s733_s6 }
  0x4d   : > { %p736_p3 = pnand %p735_p0, %p734_p12  ;;  %p742_p9 = scmp.lt.u32.totalorder %s733_s6, %s1028_s26 }
  0x4e   : > { %p741_p13 = por %p740_p10, %p739_p7 }
  0x4f   : > { %p737_p5 = pneg %p736_p3 }
  0x50   : > { %p743_p2 = por %p742_p9, %p741_p13 }
  0x52   : > { %p744_p1 = pnand %p743_p2, %p737_p5 }
  0x54   : > { %747 = shalt.err (!%p744_p1)
}
  0x55   : > { %s748_s28 = scalar_lea.vmem %s1030_s30, 128  ;;  %s871_s27 = smov [#allocation2]  }
  0x56   : > { %p749_p6 = scmp.ne.s32.totalorder %s1030_s30, %s748_s28  ;;  %s753_s20 = sshll.u32 %s871_s27, 4  ;;  %s754_s20 = int_to_ptr.vmem [resolvable:$false] %s753_s20 }
  0x57   : > { %s755_s24 = scalar_lea.vmem %s754_s20, 256  ;;  %p756_p3 = scmp.lt.s32.totalorder %s1030_s30, %s754_s20 }
  0x58   : > { %p751_p8 = pnand %p749_p6, %p735_p0  ;;  %p757_p7 = scmp.lt.s32.totalorder %s755_s24, %s748_s28 }
  0x5a   : > { %p752_p12 = pneg %p751_p8  ;;  %p758_p10 = por %p757_p7, %p756_p3 }
  0x5c   : > { %p759_p13 = pnand %p758_p10, %p752_p12 }
  0x5e   : > { %762 = shalt.err (!%p759_p13)
}
  0x5f   : > { %624 = dma.hbm_to_vmem [thread:$0]  (!%p1032_p11), %s1028_s26, 128, %s1030_s30, %s188_s5  }
  0x60   : > { %p1171_p5 = scmp.ne.s32.totalorder %s1166_s23, 0 }
  0x61   : > { %s1064_s29 = sand.u32 (!%p1171_p5), 1, %s857_s16   ;;  %p1172_p0 = scmp.ne.s32.totalorder (!%p1171_p5), %s1164_s21, 0 }
  0x62   : > { %207 = sbr.rel (%p1171_p5) target bundleno = 551 (0x227), region = 32  ;;  %s1067_s6 = sshll.u32 (!%p1171_p5), %s1064_s29, 3 }
  0x63   : > { %s210_s7 = scalar_lea.sflag (!%p1171_p5), [#allocation3], %s1064_s29  ;;  %s213_s8 = scalar_lea.vmem (!%p1171_p5), [#allocation2], %s1067_s6 }
  0x69   : > { %836 = dma.done.wait (%p1172_p0), %s210_s7, 128  }
  0x6a   : > { %838 = vsyncadd (%p1172_p0), %s210_s7, 4294967168  ;;  %p1173_p11 = scmp.eq.s32.totalorder %s923_s19, 0 }
  0x6c   : > { %840 = dma.done.wait (%p1173_p11), [#allocation6], 384   ;;  %p1174_p9 = pmov %p1173_p11 }
  0x6d   : > { %v872_v0 = vmov 0.0   ;;  %vm873_vm0 = vmmov 0   ;;  %v874_v1 = vmov 0.0|0.0   ;;  %vm253_vm1 = vcmask 64512   ;;  %v252_v2 = vld [vmem:[#allocation5] sm:$0xff]  ;;  %v251_v3 = vld [vmem:[%s213_s8] sm:$0xff] }
  0x6e   : > { %842 = vsyncadd (%p1174_p9), [#allocation6], 4294966912  ;;  %585 = vmatprep.subr.mxu0 %v872_v0  ;;  %587 = vmatprep.mubr.msk.f32.mxu0 %vm873_vm0, %v872_v0  ;;  %v329_v4 = vld [vmem:[#allocation7] sm:$0xff]  ;;  %v330_v5 = vld [vmem:[#allocation7 + $0x8] sm:$0xff]  ;;  %vm327_vm2 = vcmask 130048   ;;  %s243_s21 = scalar_lea.vmem [#allocation8], %s1067_s6 }
  0x6f   : > { %597 = vmatprep.subr.bf16.mxu1 %v874_v1  ;;  %594 = vmatprep.mubr.msk.f32.mxu1 %vm873_vm0, %v872_v0  ;;  %v598_v6 = vpack.c.bf16 %v330_v5, %v329_v4  ;;  %s576_s23 = sshll.u32 %s923_s19, 7  ;;  %s425_s26 = sshll.u32 %s243_s21, 4  ;;  %s426_s26 = int_to_ptr.vmem [resolvable:$true] %s425_s26 }
  0x70   : > { %586 = vmatpush3.msra.mxu0 %v252_v2  ;;  %s1086_s5 = scalar_lea.hbm %s1159_s3, %s576_s23  ;;  %s407_s10 = scalar_lea.sflag [#allocation4], %s1064_s29 }
  0x71   : > { %588 = vmatmul.mubr.msk.f32.vlgmr.msra.gmra.mrb[0].mxu0 %vm253_vm1, %v251_v3  ;;  %599 = vmatpush3.bf16.msra.mxu1 %v598_v6  ;;  %s763_s11 = scalar_lea.vmem %s426_s26, 128  ;;  %s875_s14 = smov [#allocation8]  }
  0x72   : > { %p764_p2 = scmp.ne.s32.totalorder %s426_s26, %s763_s11  ;;  %s767_s28 = sshll.u32 %s875_s14, 4  ;;  %s768_s28 = int_to_ptr.vmem [resolvable:$false] %s767_s28 }
  0x73   : > { %s769_s27 = scalar_lea.vmem %s768_s28, 256  ;;  %p770_p8 = scmp.lt.s32.totalorder %s426_s26, %s768_s28 }
  0x74   : > { %p765_p1 = pnand %p764_p2, %p1015_p4  ;;  %p771_p12 = scmp.lt.s32.totalorder %s769_s27, %s763_s11 }
  0x76   : > { %p766_p6 = pneg %p765_p1  ;;  %p772_p3 = por %p771_p12, %p770_p8 }
  0x78   : > { %p773_p7 = pnand %p772_p3, %p766_p6 }
 0x144   : > { %v323_v7 = vpop.f32.mrb[0].mxu0 }
 0x145   : > { %328 = vst.msk [vmem:[%s243_s21] sm:$0xff] %vm327_vm2, %v323_v7  ;;  %v589_v8 = vpop.f32.mrb[1].mxu0  ;;  %595 = vmatmul.mubr.msk.f32.vlgmr.msra.gmra.mrb[0].mxu1 %vm327_vm2, %v323_v7 }
 0x146   : > { %776 = shalt.err (!%p773_p7)
}
 0x147   : > { %s777_s20 = scalar_lea.hbm %s1086_s5, 128  ;;  %s781_s8 = scalar_lea.hbm %s1159_s3, 256 }
 0x148   : > { %p778_p10 = scmp.ne.s32.totalorder %s1086_s5, %s777_s20  ;;  %p782_p0 = scmp.lt.u32.totalorder %s1086_s5, %s1159_s3 }
 0x149   : > { %p783_p11 = scmp.lt.u32.totalorder %s781_s8, %s777_s20  ;;  %p785_p2 = scmp.lt.u32.totalorder %s777_s20, %s1086_s5 }
 0x14a   : > { %p779_p13 = pnand %p778_p10, %p1015_p4 }
 0x14b   : > { %p784_p9 = por %p783_p11, %p782_p0 }
 0x14c   : > { %p780_p5 = pneg %p779_p13 }
 0x14d   : > { %p786_p1 = por %p785_p2, %p784_p9 }
 0x14f   : > { %p787_p6 = pnand %p786_p1, %p780_p5 }
 0x151   : > { %790 = shalt.err (!%p787_p6)
}
 0x152   : > { %610 = dma.vmem_to_hbm [thread:$0]  (%p1015_p4), %s426_s26, 128, %s1086_s5, %s407_s10   ;;  %vm404_vm3 = vcmask 31744  }
 0x153   : > { %s250_s25 = scalar_lea.vmem [#allocation9], %s1067_s6  ;;  %s1112_s27 = scalar_lea.hbm %s1160_s4, %s576_s23 }
 0x154   : > { %s438_s11 = sshll.u32 %s250_s25, 4  ;;  %s412_s20 = scalar_lea.sflag [#allocation10], %s1064_s29  ;;  %s1114_s11 = int_to_ptr.vmem [resolvable:$true] %s438_s11 }
 0x155   : > { %s791_s24 = scalar_lea.vmem %s1114_s11, 128  ;;  %s876_s19 = smov [#allocation9]  }
 0x156   : > { %p792_p8 = scmp.ne.s32.totalorder %s1114_s11, %s791_s24  ;;  %s795_s6 = sshll.u32 %s876_s19, 4  ;;  %s796_s6 = int_to_ptr.vmem [resolvable:$false] %s795_s6 }
 0x157   : > { %s797_s26 = scalar_lea.vmem %s796_s6, 256  ;;  %p798_p7 = scmp.lt.s32.totalorder %s1114_s11, %s796_s6 }
 0x158   : > { %p793_p12 = pnand %p792_p8, %p1015_p4  ;;  %p799_p10 = scmp.lt.s32.totalorder %s797_s26, %s791_s24 }
 0x15a   : > { %p794_p3 = pneg %p793_p12  ;;  %p800_p13 = por %p799_p10, %p798_p7 }
 0x15c   : > { %p801_p5 = pnand %p800_p13, %p794_p3 }
 0x218   : > { %v400_v9 = vpop.f32.mrb[0].mxu1 }
 0x219   : > { %405 = vst.msk [vmem:[%s250_s25] sm:$0xff] %vm404_vm3, %v400_v9  ;;  %v596_v10 = vpop.f32.mrb[1].mxu1 }
 0x21a   : > { %804 = shalt.err (!%p801_p5)
}
 0x21b   : > { %s805_s29 = scalar_lea.hbm %s1112_s27, 128  ;;  %s809_s10 = scalar_lea.hbm %s1160_s4, 256 }
 0x21c   : > { %p806_p0 = scmp.ne.s32.totalorder %s1112_s27, %s805_s29  ;;  %p810_p2 = scmp.lt.u32.totalorder %s1112_s27, %s1160_s4 }
 0x21d   : > { %p811_p1 = scmp.lt.u32.totalorder %s809_s10, %s805_s29  ;;  %p813_p8 = scmp.lt.u32.totalorder %s805_s29, %s1112_s27 }
 0x21e   : > { %p807_p11 = pnand %p806_p0, %p1015_p4 }
 0x21f   : > { %p812_p6 = por %p811_p1, %p810_p2 }
 0x220   : > { %p808_p9 = pneg %p807_p11 }
 0x221   : > { %p814_p12 = por %p813_p8, %p812_p6 }
 0x223   : > { %p815_p3 = pnand %p814_p12, %p808_p9 }
 0x225   : > { %818 = shalt.err (!%p815_p3)
}
 0x226   : > { %611 = dma.vmem_to_hbm [thread:$0]  (%p1015_p4), %s1114_s11, 128, %s1112_s27, %s412_s20  }
 0x227 PF: > { %s450_s21 = sand.u32 1, %s853_s15   ;;  %p1175_p7 = scmp.ne.s32.totalorder %s1165_s22, 0 }
 0x228   : > { %p1176_p10 = scmp.ge.s32.totalorder %s865_s18, 2  ;;  %s451_s30 = scalar_lea.sflag [#allocation4], %s450_s21 }
 0x22a   : > { %p626_p13 = pnand %p1176_p10, %p1175_p7 }
 0x22c   : > { %844 = dma.done.wait (!%p626_p13), %s451_s30, 128  }
 0x22d   : > { %846 = vsyncadd (!%p626_p13), %s451_s30, 4294967168  ;;  %s460_s25 = scalar_lea.sflag [#allocation10], %s450_s21 }
 0x22e   : > { %848 = dma.done.wait (!%p626_p13), %s460_s25, 128  }
 0x22f   : > { %850 = vsyncadd (!%p626_p13), %s460_s25, 4294967168  ;;  %p22_p4 = scmp.ge.s32.totalorder %s1005_s9, 4   ;;  %s1177_s15 = smov %s857_s16 }
 0x230   : > { %s1178_s16 = smov %s861_s17  ;;  %s1179_s17 = smov %s1021_s13 }
 0x231   : > { %s1180_s18 = smov %s1005_s9  ;;  %24 = sbr.rel (!%p22_p4) target bundleno = 8 (0x8), region = 102 }
 0x238   :  { %465 = vsyncpa [#allocation3], 1 }
 0x239   :  { %467 = vsyncpa [#allocation3 + $0x1], 1 }
 0x23a   :  { %468 = vsyncpa [#allocation6], 1 }
 0x23b   :  { %469 = vsyncpa [#allocation4], 1 }
 0x23c   :  { %471 = vsyncpa [#allocation4 + $0x1], 1 }
 0x23d   :  { %472 = vsyncpa [#allocation10], 1 }
 0x23e   :  { %474 = vsyncpa [#allocation10 + $0x1], 1 }

</bundles_post_ra>
